<compile_context>
chip_gen: v5e
topology: v5e:2x2
jax: 0.10.0
libtpu: 0.0.40
codegen_flags: <defaults>
</compile_context>

<pallas_src>
import functools

import jax
import jax.numpy as jnp
from jax.experimental import pallas as pl
from jax.experimental.pallas import tpu as pltpu

_LANE = 128
_MIB = 1024 * 1024


def _round_up(x, m):
    return (x + m - 1) // m * m


def _tpu_hints():
    """(per-core VMEM bytes, multi-TensorCore chip?) with safe fallbacks."""
    try:
        info = pltpu.get_tpu_info()
        vmem = int(getattr(info, "vmem_capacity_bytes", 128 * _MIB))
    except Exception:
        vmem = 128 * _MIB
    # v7x: 64 MiB VMEM per TensorCore, 2 TCs/chip; v5e/v6e: 128 MiB, single TC.
    multi_core = vmem <= 64 * _MIB
    return vmem, multi_core


def _choose_node_tile(n_pad, multi_core):
    cands = (256, 128, 64)
    if multi_core:
        # Keep >= 2 grid steps so both v7x TensorCores get work.
        for c in cands:
            if n_pad % c == 0 and n_pad // c >= 2:
                return c
    # Single-TC parts (v5e/v6e): just take the largest tile that divides n_pad.
    for c in cands:
        if n_pad % c == 0:
            return c
    return n_pad


def _choose_k_tile(n_pad, kc_target):
    """Return (kc, possibly column-padded n_pad); kc is a multiple of 128."""
    kc_target = max(_LANE, (min(kc_target, n_pad) // _LANE) * _LANE)
    kc = kc_target
    while n_pad % kc != 0:
        kc -= _LANE
    if kc * 2 >= kc_target:
        return kc, n_pad
    # Awkward n_pad (kc would collapse to ~128): zero-pad the contraction dim to a
    # multiple of a mid-size tile instead of shrinking the MXU K per pass.
    kc = min(kc_target, 512)
    return kc, _round_up(n_pad, kc)


def _plan(n, o_pad_max, vmem_cap, multi_core):
    """Static tiling plan shared by all layers."""
    n_pad = _round_up(max(n, 8), _LANE)
    budget = min(vmem_cap // 2, 64 * _MIB)
    # Keep Y resident in VMEM (bf16) if it comfortably fits alongside the A pipeline
    # (counted double-buffered to be conservative).
    y_resident = 2 * n_pad * o_pad_max * 2 <= budget // 3
    # kc sizing: double-buffered bf16 A tiles (2 * tn * kc * 2B, tn<=256) plus, if Y is
    # streamed, double-buffered bf16 Y chunks (2 * kc * o_pad * 2B) within ~half the budget.
    per_kc_bytes = 2 * 256 * 2 + (0 if y_resident else 2 * o_pad_max * 2)
    kc_target = max(_LANE, min(2048, (budget // 2) // per_kc_bytes))
    kc, n_pad = _choose_k_tile(n_pad, kc_target)
    tn = _choose_node_tile(n_pad, multi_core)
    return n_pad, tn, kc, y_resident


# ---------------------------------------------------------------------------
# Kernel 1: per-node-tile linear projection  Y = H @ W   (emitted bf16)
# ---------------------------------------------------------------------------
def _proj_kernel(h_ref, w_ref, y_ref):
    y_ref[...] = jnp.dot(h_ref[...], w_ref[...],
                         preferred_element_type=jnp.float32).astype(y_ref.dtype)


def _project(h, w, *, tn):
    n_pad, f_pad = h.shape
    o_pad = w.shape[1]
    cost = pl.CostEstimate(
        flops=2 * n_pad * f_pad * o_pad,
        transcendentals=0,
        bytes_accessed=4 * n_pad * f_pad + 4 * f_pad * o_pad + 2 * n_pad * o_pad,
    )
    return pl.pallas_call(
        _proj_kernel,
        out_shape=jax.ShapeDtypeStruct((n_pad, o_pad), jnp.bfloat16),
        grid_spec=pl.GridSpec(
            grid=(n_pad // tn,),
            in_specs=[
                pl.BlockSpec((tn, f_pad), lambda i: (i, 0)),      # H node tile (f32)
                pl.BlockSpec((f_pad, o_pad), lambda i: (0, 0)),   # full W, constant index
            ],
            out_specs=pl.BlockSpec((tn, o_pad), lambda i: (i, 0)),
        ),
        compiler_params=pltpu.CompilerParams(
            dimension_semantics=("parallel",)),
        cost_estimate=cost,
    )(h, w)


# ---------------------------------------------------------------------------
# Kernel 2: neighbor-sum aggregation  out = (A + I) @ Y + b   (K-tiled over A cols)
# ---------------------------------------------------------------------------
def _agg_kernel(a_ref, y_ref, b_ref, o_ref, acc_ref, *, kc, y_resident):
    k = pl.program_id(1)

    @pl.when(k == 0)
    def _():
        acc_ref[...] = jnp.zeros_like(acc_ref)

    if y_resident:
        start = pl.multiple_of(k * kc, kc)
        y = y_ref[pl.ds(start, kc), :]
    else:
        y = y_ref[...]

    # bf16 x bf16 -> f32 accumulate on the MXU (A+I holds exact 0/1/2 values).
    acc_ref[...] += jnp.dot(a_ref[...], y, preferred_element_type=jnp.float32)

    @pl.when(k == pl.num_programs(1) - 1)
    def _():
        o_ref[...] = (acc_ref[...] + b_ref[...]).astype(o_ref.dtype)


def _aggregate(adj_bf16, y, b_row, *, tn, kc, y_resident, vmem_cap):
    n_pad = adj_bf16.shape[0]
    o_pad = y.shape[1]
    nk = n_pad // kc

    if y_resident:
        # Full Y stays in VMEM; constant block index -> fetched once per core.
        y_spec = pl.BlockSpec((n_pad, o_pad), lambda i, k: (0, 0))
        y_hbm_bytes = n_pad * o_pad * 2
        y_vmem_bytes = 2 * n_pad * o_pad * 2
    else:
        # Streamed bf16 column chunks (re-fetched once per node tile).
        y_spec = pl.BlockSpec((kc, o_pad), lambda i, k: (k, 0))
        y_hbm_bytes = (n_pad // tn) * n_pad * o_pad * 2
        y_vmem_bytes = 2 * kc * o_pad * 2

    cost = pl.CostEstimate(
        flops=2 * n_pad * n_pad * o_pad,
        transcendentals=0,
        bytes_accessed=2 * n_pad * n_pad + y_hbm_bytes + 4 * n_pad * o_pad + 4 * o_pad,
    )

    vmem_needed = (
        2 * tn * kc * 2          # A tiles (bf16), double-buffered
        + y_vmem_bytes           # Y (resident full array or streamed chunks)
        + 2 * tn * o_pad * 4     # output tile, double-buffered
        + tn * o_pad * 4         # f32 accumulator scratch
        + 2 * o_pad * 4          # bias row
    )
    vmem_limit = int(min(max(2 * vmem_needed, 32 * _MIB),
                         max(32 * _MIB, (vmem_cap * 3) // 4)))

    kernel = functools.partial(_agg_kernel, kc=kc, y_resident=y_resident)
    return pl.pallas_call(
        kernel,
        out_shape=jax.ShapeDtypeStruct((n_pad, o_pad), jnp.float32),
        grid_spec=pltpu.PrefetchScalarGridSpec(
            num_scalar_prefetch=0,
            grid=(n_pad // tn, nk),
            in_specs=[
                pl.BlockSpec((tn, kc), lambda i, k: (i, k)),      # (A+I) tile, bf16
                y_spec,                                           # Y, bf16
                pl.BlockSpec((1, o_pad), lambda i, k: (0, 0)),    # bias row
            ],
            out_specs=pl.BlockSpec((tn, o_pad), lambda i, k: (i, 0)),
            scratch_shapes=[pltpu.VMEM((tn, o_pad), jnp.float32)],
        ),
        compiler_params=pltpu.CompilerParams(
            dimension_semantics=("parallel", "arbitrary"),
            vmem_limit_bytes=vmem_limit,
        ),
        cost_estimate=cost,
    )(adj_bf16, y, b_row)


def _gin_layer(adj_bf16, h, w, b_row, *, tn, kc, y_resident, vmem_cap):
    y = _project(h, w, tn=tn)
    return _aggregate(adj_bf16, y, b_row, tn=tn, kc=kc,
                      y_resident=y_resident, vmem_cap=vmem_cap)


# ---------------------------------------------------------------------------
# Full forward pass (input layer, shared hidden layers, output layer)
# ---------------------------------------------------------------------------
@functools.partial(jax.jit, static_argnames=(
    "n_hidden_layers", "n_pad", "f_pad", "h_pad", "c_pad",
    "tn", "kc", "y_resident", "vmem_cap"))
def _gin_forward_impl(adj, features, params, *, n_hidden_layers, n_pad, f_pad,
                      h_pad, c_pad, tn, kc, y_resident, vmem_cap):
    n = adj.shape[0]
    in_feats = features.shape[1]
    w_in, b_in = params["input"]
    w_hid, b_hid = params["hidden"]
    w_out, b_out = params["output"]
    n_classes = w_out.shape[1]

    # Fold the GIN self term (eps = 0) into the adjacency: out = (A + I) @ Y + b.
    # Values {0,1,2} are exact in bf16, halving HBM traffic of the dominant (N, N) operand.
    adj_si = adj.astype(jnp.float32) + jnp.eye(n, dtype=jnp.float32)
    adj_p = jnp.zeros((n_pad, n_pad), jnp.bfloat16).at[:n, :n].set(
        adj_si.astype(jnp.bfloat16))
    h0 = jnp.zeros((n_pad, f_pad), jnp.float32).at[:n, :in_feats].set(features)

    def pad_w(w, r, c):
        return jnp.zeros((r, c), jnp.float32).at[:w.shape[0], :w.shape[1]].set(w)

    def pad_b(b, c):
        return jnp.zeros((1, c), jnp.float32).at[0, :b.shape[0]].set(b)

    layer = functools.partial(_gin_layer, adj_p, tn=tn, kc=kc,
                              y_resident=y_resident, vmem_cap=vmem_cap)

    h = layer(h0, pad_w(w_in, f_pad, h_pad), pad_b(b_in, h_pad))
    for _ in range(n_hidden_layers - 1):
        h = layer(h, pad_w(w_hid, h_pad, h_pad), pad_b(b_hid, h_pad))
    h = layer(h, pad_w(w_out, h_pad, c_pad), pad_b(b_out, c_pad))
    return h[:n, :n_classes]


def gin_forward(adj, features, params, n_hidden_layers):
    n = adj.shape[0]
    in_feats = features.shape[1]
    n_hidden = params["input"][0].shape[1]
    n_classes = params["output"][0].shape[1]

    f_pad = _round_up(in_feats, _LANE)
    h_pad = _round_up(n_hidden, _LANE)
    c_pad = _round_up(n_classes, _LANE)

    vmem_cap, multi_core = _tpu_hints()
    n_pad, tn, kc, y_resident = _plan(n, max(h_pad, c_pad), vmem_cap, multi_core)

    return _gin_forward_impl(
        adj, features, params,
        n_hidden_layers=n_hidden_layers, n_pad=n_pad, f_pad=f_pad,
        h_pad=h_pad, c_pad=c_pad, tn=tn, kc=kc,
        y_resident=y_resident, vmem_cap=vmem_cap)


def gin_forward_ref(adj, features, params, n_hidden_layers):
    """Pure-JAX reference for correctness checking."""
    def layer(h, w, b):
        return (adj @ h + h) @ w + b

    w_in, b_in = params["input"]
    w_hid, b_hid = params["hidden"]
    w_out, b_out = params["output"]
    h = layer(features, w_in, b_in)
    for _ in range(n_hidden_layers - 1):
        h = layer(h, w_hid, b_hid)
    h = layer(h, w_out, b_out)
    return h


def init_linear(key, fan_in, fan_out):
    """Deterministic init matching nn.Linear shapes (weight stored transposed: (in, out))."""
    kw, kb = jax.random.split(key)
    bound = 1.0 / jnp.sqrt(fan_in)
    w = jax.random.uniform(kw, (fan_in, fan_out), jnp.float32, -bound, bound)
    b = jax.random.uniform(kb, (fan_out,), jnp.float32, -bound, bound)
    return w, b


if __name__ == "__main__":
    # Small synthetic problem.
    N = 128
    in_feats = 16
    n_hidden = 32
    n_classes = 8
    n_hidden_layers = 2   # total GINConv layers = 1 + (n_hidden_layers - 1) + 1 = 3

    key = jax.random.PRNGKey(0)
    k_adj, k_feat, k_in, k_hid, k_out = jax.random.split(key, 5)

    # Dense random adjacency (0/1), symmetric, no self-loops.
    a_rand = jax.random.bernoulli(k_adj, p=0.05, shape=(N, N)).astype(jnp.float32)
    adj = jnp.maximum(a_rand, a_rand.T) * (1.0 - jnp.eye(N, dtype=jnp.float32))

    features = jax.random.normal(k_feat, (N, in_feats), jnp.float32)

    params = {
        "input": init_linear(k_in, in_feats, n_hidden),
        "hidden": init_linear(k_hid, n_hidden, n_hidden),
        "output": init_linear(k_out, n_hidden, n_classes),
    }

    out = gin_forward(adj, features, params, n_hidden_layers=n_hidden_layers)
    out = jax.block_until_ready(out)

    ref = gin_forward_ref(adj, features, params, n_hidden_layers)
    assert out.shape == (N, n_classes)
    # Y is emitted in bf16 (accumulation stays f32), so allow ~1% scaled error.
    rel_err = float(jnp.max(jnp.abs(out - ref)) / (jnp.max(jnp.abs(ref)) + 1e-6))
    assert rel_err < 3e-2, f"Pallas output mismatch vs reference (rel err {rel_err:.2e})"

    print("KERNEL_OK")
</pallas_src>

<mosaic_0001>
module attributes {stable_mosaic.version = 11 : i64} {
  func.func @_proj_kernel(%arg0: i32, %arg1: memref<128x128xf32, #tpu.memory_space<vmem>>, %arg2: memref<128x128xf32, #tpu.memory_space<vmem>>, %arg3: memref<128x128xbf16, #tpu.memory_space<vmem>>) attributes {dimension_semantics = [#tpu.dimension_semantics<parallel>], iteration_bounds = array<i64: 1>, scalar_prefetch = 0 : i64, scratch_operands = 0 : i64, tpu.core_type = #tpu.core_type<tc>, window_params = [{transform_indices = @transform_0, window_bounds = array<i64: 128, 128>}, {pipeline_mode = #tpu.pipeline_mode<synchronous>, transform_indices = @transform_1, window_bounds = array<i64: 128, 128>}, {transform_indices = @transform_2, window_bounds = array<i64: 128, 128>}]} {
    %c0 = arith.constant 0 : index
    %c0_0 = arith.constant 0 : index
    %0 = vector.load %arg1[%c0, %c0_0] : memref<128x128xf32, #tpu.memory_space<vmem>>, vector<128x128xf32>
    %c0_1 = arith.constant 0 : index
    %c0_2 = arith.constant 0 : index
    %1 = vector.load %arg2[%c0_1, %c0_2] : memref<128x128xf32, #tpu.memory_space<vmem>>, vector<128x128xf32>
    %cst = arith.constant dense<0.000000e+00> : vector<128x128xf32>
    %2 = tpu.matmul %0, %1, %cst {dimension_numbers = #tpu.dot_dimension_numbers<[1], [0], [0], [1], [0, 0, 1, 1], [], []>} : vector<128x128xf32>, vector<128x128xf32>, vector<128x128xf32> -> vector<128x128xf32>
    %3 = arith.truncf %2 : vector<128x128xf32> to vector<128x128xbf16>
    %c0_3 = arith.constant 0 : index
    %c0_4 = arith.constant 0 : index
    %4 = vector.load %arg3[%c0_3, %c0_4] : memref<128x128xbf16, #tpu.memory_space<vmem>>, vector<128x128xbf16>
    tpu.vector_store %arg3[%c0_3, %c0_4], %3 {strides = array<i32>} : memref<128x128xbf16, #tpu.memory_space<vmem>>, vector<128x128xbf16>,
    return
  }
  func.func @transform_0(%arg0: i32) -> (i32, i32) {
    %c0_i32 = arith.constant 0 : i32
    %c0_i32_0 = arith.constant 0 : i32
    return %arg0, %c0_i32 : i32, i32
  }
  func.func @transform_1(%arg0: i32) -> (i32, i32) {
    %c0_i32 = arith.constant 0 : i32
    %c0_i32_0 = arith.constant 0 : i32
    %c0_i32_1 = arith.constant 0 : i32
    return %c0_i32, %c0_i32_0 : i32, i32
  }
  func.func @transform_2(%arg0: i32) -> (i32, i32) {
    %c0_i32 = arith.constant 0 : i32
    %c0_i32_0 = arith.constant 0 : i32
    return %arg0, %c0_i32 : i32, i32
  }
}

module attributes {stable_mosaic.version = 11 : i64} {
  func.func @_agg_kernel(%arg0: i32, %arg1: i32, %arg2: memref<128x128xbf16, #tpu.memory_space<vmem>>, %arg3: memref<128x128xbf16, #tpu.memory_space<vmem>>, %arg4: memref<1x128xf32, #tpu.memory_space<vmem>>, %arg5: memref<128x128xf32, #tpu.memory_space<vmem>>, %arg6: memref<128x128xf32, #tpu.memory_space<vmem>>) attributes {dimension_semantics = [#tpu.dimension_semantics<parallel>, #tpu.dimension_semantics<arbitrary>], iteration_bounds = array<i64: 1, 1>, scalar_prefetch = 0 : i64, scratch_operands = 1 : i64, tpu.core_type = #tpu.core_type<tc>, window_params = [{transform_indices = @transform_0, window_bounds = array<i64: 128, 128>}, {pipeline_mode = #tpu.pipeline_mode<synchronous>, transform_indices = @transform_1, window_bounds = array<i64: 128, 128>}, {pipeline_mode = #tpu.pipeline_mode<synchronous>, transform_indices = @transform_2, window_bounds = array<i64: 1, 128>}, {transform_indices = @transform_3, window_bounds = array<i64: 128, 128>}]} {
    %c0_i32 = arith.constant 0 : i32
    %0 = arith.cmpi eq, %arg1, %c0_i32 : i32
    %1 = arith.extui %0 : i1 to i32
    %c0_i32_0 = arith.constant 0 : i32
    %2 = arith.cmpi ne, %1, %c0_i32_0 : i32
    scf.if %2 {
      %cst_9 = arith.constant 0.000000e+00 : f32
      %15 = vector.broadcast %cst_9 : f32 to vector<128x128xf32>
      %c0_10 = arith.constant 0 : index
      %c0_11 = arith.constant 0 : index
      %16 = vector.load %arg6[%c0_10, %c0_11] : memref<128x128xf32, #tpu.memory_space<vmem>>, vector<128x128xf32>
      tpu.vector_store %arg6[%c0_10, %c0_11], %15 {strides = array<i32>} : memref<128x128xf32, #tpu.memory_space<vmem>>, vector<128x128xf32>,
    } else {
    }
    %c128_i32 = arith.constant 128 : i32
    %3 = arith.muli %arg1, %c128_i32 : i32
    %4 = tpu.assume_multiple %3, 128 : i32
    %5 = arith.index_cast %4 : i32 to index
    %c0 = arith.constant 0 : index
    %6 = vector.load %arg3[%5, %c0] : memref<128x128xbf16, #tpu.memory_space<vmem>>, vector<128x128xbf16>
    %c0_1 = arith.constant 0 : index
    %c0_2 = arith.constant 0 : index
    %7 = vector.load %arg6[%c0_1, %c0_2] : memref<128x128xf32, #tpu.memory_space<vmem>>, vector<128x128xf32>
    %c0_3 = arith.constant 0 : index
    %c0_4 = arith.constant 0 : index
    %8 = vector.load %arg2[%c0_3, %c0_4] : memref<128x128xbf16, #tpu.memory_space<vmem>>, vector<128x128xbf16>
    %cst = arith.constant dense<0.000000e+00> : vector<128x128xf32>
    %9 = tpu.matmul %8, %6, %cst {dimension_numbers = #tpu.dot_dimension_numbers<[1], [0], [0], [1], [0, 0, 1, 1], [], []>} : vector<128x128xbf16>, vector<128x128xbf16>, vector<128x128xf32> -> vector<128x128xf32>
    %10 = arith.addf %7, %9 : vector<128x128xf32>
    %c0_5 = arith.constant 0 : index
    %c0_6 = arith.constant 0 : index
    %11 = vector.load %arg6[%c0_5, %c0_6] : memref<128x128xf32, #tpu.memory_space<vmem>>, vector<128x128xf32>
    tpu.vector_store %arg6[%c0_5, %c0_6], %10 {strides = array<i32>} : memref<128x128xf32, #tpu.memory_space<vmem>>, vector<128x128xf32>,
    %c0_i32_7 = arith.constant 0 : i32
    %12 = arith.cmpi eq, %arg1, %c0_i32_7 : i32
    %13 = arith.extui %12 : i1 to i32
    %c0_i32_8 = arith.constant 0 : i32
    %14 = arith.cmpi ne, %13, %c0_i32_8 : i32
    scf.if %14 {
      %c0_9 = arith.constant 0 : index
      %c0_10 = arith.constant 0 : index
      %15 = vector.load %arg6[%c0_9, %c0_10] : memref<128x128xf32, #tpu.memory_space<vmem>>, vector<128x128xf32>
      %c0_11 = arith.constant 0 : index
      %c0_12 = arith.constant 0 : index
      %16 = vector.load %arg4[%c0_11, %c0_12] : memref<1x128xf32, #tpu.memory_space<vmem>>, vector<1x128xf32>
      %17 = vector.broadcast %16 : vector<1x128xf32> to vector<128x128xf32>
      %18 = arith.addf %15, %17 : vector<128x128xf32>
      %c0_13 = arith.constant 0 : index
      %c0_14 = arith.constant 0 : index
      %19 = vector.load %arg5[%c0_13, %c0_14] : memref<128x128xf32, #tpu.memory_space<vmem>>, vector<128x128xf32>
      tpu.vector_store %arg5[%c0_13, %c0_14], %18 {strides = array<i32>} : memref<128x128xf32, #tpu.memory_space<vmem>>, vector<128x128xf32>,
    } else {
    }
    return
  }
  func.func @transform_0(%arg0: i32, %arg1: i32) -> (i32, i32) {
    %c0_i32 = arith.constant 0 : i32
    return %arg0, %arg1 : i32, i32
  }
  func.func @transform_1(%arg0: i32, %arg1: i32) -> (i32, i32) {
    %c0_i32 = arith.constant 0 : i32
    %c0_i32_0 = arith.constant 0 : i32
    %c0_i32_1 = arith.constant 0 : i32
    return %c0_i32, %c0_i32_0 : i32, i32
  }
  func.func @transform_2(%arg0: i32, %arg1: i32) -> (i32, i32) {
    %c0_i32 = arith.constant 0 : i32
    %c0_i32_0 = arith.constant 0 : i32
    %c0_i32_1 = arith.constant 0 : i32
    return %c0_i32, %c0_i32_0 : i32, i32
  }
  func.func @transform_3(%arg0: i32, %arg1: i32) -> (i32, i32) {
    %c0_i32 = arith.constant 0 : i32
    %c0_i32_0 = arith.constant 0 : i32
    return %arg0, %c0_i32 : i32, i32
  }
}

</mosaic_0001>

<bundles_post_ra>
// kernel: _gin_forward_impl.6
= control target key start
LH: loop header
LB: loop body
LE: loop exit
PB: predicated region body
PF: predicated region fallthrough
CT: control target
= control target key end

     0   :  { %s374_s1 = inlined_call_operand.vmem [shape: f32[128,128], index: 1, kind: input, shape index: {}]   ;;  %s375_s0 = inlined_call_operand.vmem [shape: f32[128,128], index: 0, kind: input, shape index: {}]   ;;  %s376_s2 = inlined_call_operand.vmem [shape: bf16[128,128], index: 2, kind: output, shape index: {}]  }
   0x1   :  { %v42_v0 = vld [vmem:[%s374_s1 + $0x78] sm:$0xff]  ;;  %v41_v1 = vld [vmem:[%s374_s1 + $0x70] sm:$0xff]  ;;  %v40_v2 = vld [vmem:[%s374_s1 + $0x68] sm:$0xff] }
   0x2   :  { %43 = vmatpush.msra.mxu0 %v42_v0  ;;  %191 = vmatpush.msra.mxu1 %v42_v0  ;;  %v39_v3 = vld [vmem:[%s374_s1 + $0x60] sm:$0xff]  ;;  %v38_v4 = vld [vmem:[%s374_s1 + $0x58] sm:$0xff]  ;;  %v37_v5 = vld [vmem:[%s374_s1 + $0x50] sm:$0xff] }
   0x3   :  { %192 = vmatpush.msra.mxu2 %v42_v0  ;;  %193 = vmatpush.msra.mxu3 %v42_v0  ;;  %v36_v6 = vld [vmem:[%s374_s1 + $0x48] sm:$0xff]  ;;  %v35_v7 = vld [vmem:[%s374_s1 + $0x40] sm:$0xff]  ;;  %v34_v8 = vld [vmem:[%s374_s1 + $0x38] sm:$0xff] }
   0x4   :  { %44 = vmatpush.msra.mxu0 %v41_v1  ;;  %194 = vmatpush.msra.mxu1 %v41_v1  ;;  %v33_v9 = vld [vmem:[%s374_s1 + $0x30] sm:$0xff]  ;;  %v32_v10 = vld [vmem:[%s374_s1 + $0x28] sm:$0xff]  ;;  %v31_v11 = vld [vmem:[%s374_s1 + $0x20] sm:$0xff] }
   0x5   :  { %195 = vmatpush.msra.mxu2 %v41_v1  ;;  %196 = vmatpush.msra.mxu3 %v41_v1  ;;  %v30_v12 = vld [vmem:[%s374_s1 + $0x18] sm:$0xff]  ;;  %v29_v13 = vld [vmem:[%s374_s1 + $0x10] sm:$0xff]  ;;  %v28_v14 = vld [vmem:[%s374_s1 + $0x8] sm:$0xff] }
   0x6   :  { %45 = vmatpush.msra.mxu0 %v40_v2  ;;  %197 = vmatpush.msra.mxu1 %v40_v2  ;;  %v27_v15 = vld [vmem:[%s374_s1] sm:$0xff]  ;;  %v12_v20 = vld [vmem:[%s375_s0 + $0x8] sm:$0xff]  ;;  %v13_v24 = vld [vmem:[%s375_s0 + $0x10] sm:$0xff] }
   0x7   :  { %198 = vmatpush.msra.mxu2 %v40_v2  ;;  %199 = vmatpush.msra.mxu3 %v40_v2  ;;  %v11_v16 = vld [vmem:[%s375_s0] sm:$0xff]  ;;  %v16_v21 = vld [vmem:[%s375_s0 + $0x28] sm:$0xff]  ;;  %v17_v25 = vld [vmem:[%s375_s0 + $0x30] sm:$0xff] }
   0x8   :  { %46 = vmatpush.msra.mxu0 %v39_v3  ;;  %200 = vmatpush.msra.mxu1 %v39_v3  ;;  %v15_v17 = vld [vmem:[%s375_s0 + $0x20] sm:$0xff]  ;;  %v20_v22 = vld [vmem:[%s375_s0 + $0x48] sm:$0xff]  ;;  %v21_v26 = vld [vmem:[%s375_s0 + $0x50] sm:$0xff] }
   0x9   :  { %201 = vmatpush.msra.mxu2 %v39_v3  ;;  %202 = vmatpush.msra.mxu3 %v39_v3  ;;  %v19_v18 = vld [vmem:[%s375_s0 + $0x40] sm:$0xff]  ;;  %v24_v23 = vld [vmem:[%s375_s0 + $0x68] sm:$0xff]  ;;  %v25_v27 = vld [vmem:[%s375_s0 + $0x70] sm:$0xff] }
   0xa   :  { %47 = vmatpush.msra.mxu0 %v38_v4  ;;  %203 = vmatpush.msra.mxu1 %v38_v4  ;;  %v23_v19 = vld [vmem:[%s375_s0 + $0x60] sm:$0xff]  ;;  %v14_v28 = vld [vmem:[%s375_s0 + $0x18] sm:$0xff] }
   0xb   :  { %204 = vmatpush.msra.mxu2 %v38_v4  ;;  %205 = vmatpush.msra.mxu3 %v38_v4  ;;  %v18_v29 = vld [vmem:[%s375_s0 + $0x38] sm:$0xff] }
   0xc   :  { %48 = vmatpush.msra.mxu0 %v37_v5  ;;  %206 = vmatpush.msra.mxu1 %v37_v5  ;;  %v22_v30 = vld [vmem:[%s375_s0 + $0x58] sm:$0xff] }
   0xd   :  { %207 = vmatpush.msra.mxu2 %v37_v5  ;;  %208 = vmatpush.msra.mxu3 %v37_v5  ;;  %v26_v31 = vld [vmem:[%s375_s0 + $0x78] sm:$0xff] }
   0xe   :  { %49 = vmatpush.msra.mxu0 %v36_v6  ;;  %209 = vmatpush.msra.mxu1 %v36_v6 }
   0xf   :  { %210 = vmatpush.msra.mxu2 %v36_v6  ;;  %211 = vmatpush.msra.mxu3 %v36_v6 }
  0x10   :  { %50 = vmatpush.msra.mxu0 %v35_v7  ;;  %212 = vmatpush.msra.mxu1 %v35_v7 }
  0x11   :  { %213 = vmatpush.msra.mxu2 %v35_v7  ;;  %214 = vmatpush.msra.mxu3 %v35_v7 }
  0x12   :  { %51 = vmatpush.msra.mxu0 %v34_v8  ;;  %215 = vmatpush.msra.mxu1 %v34_v8 }
  0x13   :  { %216 = vmatpush.msra.mxu2 %v34_v8  ;;  %217 = vmatpush.msra.mxu3 %v34_v8 }
  0x14   :  { %52 = vmatpush.msra.mxu0 %v33_v9  ;;  %218 = vmatpush.msra.mxu1 %v33_v9 }
  0x15   :  { %219 = vmatpush.msra.mxu2 %v33_v9  ;;  %220 = vmatpush.msra.mxu3 %v33_v9 }
  0x16   :  { %53 = vmatpush.msra.mxu0 %v32_v10  ;;  %221 = vmatpush.msra.mxu1 %v32_v10 }
  0x17   :  { %222 = vmatpush.msra.mxu2 %v32_v10  ;;  %223 = vmatpush.msra.mxu3 %v32_v10 }
  0x18   :  { %54 = vmatpush.msra.mxu0 %v31_v11  ;;  %224 = vmatpush.msra.mxu1 %v31_v11 }
  0x19   :  { %225 = vmatpush.msra.mxu2 %v31_v11  ;;  %226 = vmatpush.msra.mxu3 %v31_v11 }
  0x1a   :  { %55 = vmatpush.msra.mxu0 %v30_v12  ;;  %227 = vmatpush.msra.mxu1 %v30_v12 }
  0x1b   :  { %228 = vmatpush.msra.mxu2 %v30_v12  ;;  %229 = vmatpush.msra.mxu3 %v30_v12 }
  0x1c   :  { %56 = vmatpush.msra.mxu0 %v29_v13  ;;  %230 = vmatpush.msra.mxu1 %v29_v13 }
  0x1d   :  { %231 = vmatpush.msra.mxu2 %v29_v13  ;;  %232 = vmatpush.msra.mxu3 %v29_v13 }
  0x1e   :  { %57 = vmatpush.msra.mxu0 %v28_v14  ;;  %233 = vmatpush.msra.mxu1 %v28_v14 }
  0x1f   :  { %234 = vmatpush.msra.mxu2 %v28_v14  ;;  %235 = vmatpush.msra.mxu3 %v28_v14 }
  0x20   :  { %58 = vmatpush.msra.mxu0 %v27_v15  ;;  %236 = vmatpush.msra.mxu1 %v27_v15 }
  0x21   :  { %237 = vmatpush.msra.mxu2 %v27_v15  ;;  %238 = vmatpush.msra.mxu3 %v27_v15 }
  0x22   :  { %59 = vmatmul.f32.vlgmr.msra.gmra.mxu0 %v11_v16  ;;  %71 = vmatmul.f32.vlgmr.msra.gmra.mxu1 %v15_v17 }
  0x23   :  { %83 = vmatmul.f32.vlgmr.msra.gmra.mxu2 %v19_v18  ;;  %95 = vmatmul.f32.vlgmr.msra.gmra.mxu3 %v23_v19 }
  0x2a   :  { %62 = vmatmul.f32.gmra.mxu0 %v12_v20  ;;  %74 = vmatmul.f32.gmra.mxu1 %v16_v21 }
  0x2b   :  { %86 = vmatmul.f32.gmra.mxu2 %v20_v22  ;;  %98 = vmatmul.f32.gmra.mxu3 %v24_v23 }
  0x32   :  { %65 = vmatmul.f32.gmra.mxu0 %v13_v24  ;;  %77 = vmatmul.f32.gmra.mxu1 %v17_v25 }
  0x33   :  { %89 = vmatmul.f32.gmra.mxu2 %v21_v26  ;;  %101 = vmatmul.f32.gmra.mxu3 %v25_v27 }
  0x3a   :  { %68 = vmatmul.f32.gmra.mxu0 %v14_v28  ;;  %80 = vmatmul.f32.gmra.mxu1 %v18_v29 }
  0x3b   :  { %92 = vmatmul.f32.gmra.mxu2 %v22_v30  ;;  %104 = vmatmul.f32.gmra.mxu3 %v26_v31 }
  0x9f   :  { %v60_v32 = vpop.f32.mrf.mxu0  ;;  %v72_v33 = vpop.f32.mrf.mxu1 }
  0xa6   :  { %v84_v34 = vpop.f32.mrf.mxu2  ;;  %v96_v35 = vpop.f32.mrf.mxu3 }
  0xa7   :  { %v63_v36 = vpop.f32.mrf.mxu0  ;;  %v75_v37 = vpop.f32.mrf.mxu1 }
  0xa8   :  { %v147_v38 = vpack.c.bf16 %v63_v36, %v60_v32  ;;  %v157_v39 = vpack.c.bf16 %v75_v37, %v72_v33 }
  0xaa   :  { %148 = vst [vmem:[%s376_s2] sm:$0xff] %v147_v38  }
  0xab   :  { %185 = vst [vmem:[%s376_s2 + $0x10] sm:$0xff] %v157_v39  }
  0xae   :  { %v87_v40 = vpop.f32.mrf.mxu2  ;;  %v99_v41 = vpop.f32.mrf.mxu3 }
  0xaf   :  { %v167_v42 = vpack.c.bf16 %v87_v40, %v84_v34  ;;  %v177_v43 = vpack.c.bf16 %v99_v41, %v96_v35  ;;  %v66_v44 = vpop.f32.mrf.mxu0  ;;  %v78_v45 = vpop.f32.mrf.mxu1 }
  0xb1   :  { %187 = vst [vmem:[%s376_s2 + $0x20] sm:$0xff] %v167_v42  }
  0xb2   :  { %189 = vst [vmem:[%s376_s2 + $0x30] sm:$0xff] %v177_v43  }
  0xb6   :  { %v90_v46 = vpop.f32.mrf.mxu2  ;;  %v102_v47 = vpop.f32.mrf.mxu3 }
  0xb7   :  { %v69_v48 = vpop.f32.mrf.mxu0  ;;  %v81_v49 = vpop.f32.mrf.mxu1 }
  0xb8   :  { %v152_v50 = vpack.c.bf16 %v69_v48, %v66_v44  ;;  %v162_v51 = vpack.c.bf16 %v81_v49, %v78_v45 }
  0xba   :  { %184 = vst [vmem:[%s376_s2 + $0x8] sm:$0xff] %v152_v50  }
  0xbb   :  { %186 = vst [vmem:[%s376_s2 + $0x18] sm:$0xff] %v162_v51  }
  0xbe   :  { %v93_v52 = vpop.f32.mrf.mxu2  ;;  %v105_v53 = vpop.f32.mrf.mxu3 }
  0xbf   :  { %v172_v54 = vpack.c.bf16 %v93_v52, %v90_v46  ;;  %v182_v55 = vpack.c.bf16 %v105_v53, %v102_v47 }
  0xc1   :  { %188 = vst [vmem:[%s376_s2 + $0x28] sm:$0xff] %v172_v54  }
  0xc2   :  { %190 = vst [vmem:[%s376_s2 + $0x38] sm:$0xff] %v182_v55  }

// kernel: _gin_forward_impl.7
= control target key start
LH: loop header
LB: loop body
LE: loop exit
PB: predicated region body
PF: predicated region fallthrough
CT: control target
= control target key end

     0   :  { %s549_s1 = inlined_call_operand.vmem [shape: bf16[128,128], index: 1, kind: input, shape index: {}]   ;;  %s550_s2 = inlined_call_operand.vmem [shape: f32[1,128], index: 2, kind: input, shape index: {}]   ;;  %s551_s0 = inlined_call_operand.vmem [shape: bf16[128,128], index: 0, kind: input, shape index: {}]   ;;  %s552_s3 = inlined_call_operand.vmem [shape: f32[128,128], index: 3, kind: output, shape index: {}]  }
   0x1   :  { %v396_v0 = vld [vmem:[%s549_s1 + $0x38] sm:$0xff]  ;;  %v395_v1 = vld [vmem:[%s549_s1 + $0x30] sm:$0xff]  ;;  %v394_v2 = vld [vmem:[%s549_s1 + $0x28] sm:$0xff] }
   0x2   :  { %183 = vmatpush.bf16.msra.mxu0 %v396_v0  ;;  %405 = vmatpush.bf16.msra.mxu1 %v396_v0  ;;  %v393_v3 = vld [vmem:[%s549_s1 + $0x20] sm:$0xff]  ;;  %v392_v4 = vld [vmem:[%s549_s1 + $0x18] sm:$0xff]  ;;  %v391_v5 = vld [vmem:[%s549_s1 + $0x10] sm:$0xff] }
   0x3   :  { %406 = vmatpush.bf16.msra.mxu2 %v396_v0  ;;  %407 = vmatpush.bf16.msra.mxu3 %v396_v0  ;;  %v390_v6 = vld [vmem:[%s549_s1 + $0x8] sm:$0xff]  ;;  %v389_v7 = vld [vmem:[%s549_s1] sm:$0xff]  ;;  %v399_v9 = vld [vmem:[%s551_s0 + $0x10] sm:$0xff] }
   0x4   :  { %v397_v8 = vld [vmem:[%s551_s0] sm:$0xff]  ;;  %v403_v11 = vld [vmem:[%s551_s0 + $0x30] sm:$0xff]  ;;  %v398_v12 = vld [vmem:[%s551_s0 + $0x8] sm:$0xff] }
   0x5   :  { %v401_v10 = vld [vmem:[%s551_s0 + $0x20] sm:$0xff]  ;;  %v400_v13 = vld [vmem:[%s551_s0 + $0x18] sm:$0xff]  ;;  %v402_v14 = vld [vmem:[%s551_s0 + $0x28] sm:$0xff] }
   0x6   :  { %184 = vmatpush.bf16.msra.mxu0 %v395_v1  ;;  %408 = vmatpush.bf16.msra.mxu1 %v395_v1  ;;  %v404_v15 = vld [vmem:[%s551_s0 + $0x38] sm:$0xff]  ;;  %v429_v16 = vld [vmem:[%s550_s2] ss:$0 sm:$0xff] }
   0x7   :  { %409 = vmatpush.bf16.msra.mxu2 %v395_v1  ;;  %410 = vmatpush.bf16.msra.mxu3 %v395_v1 }
   0xa   :  { %185 = vmatpush.bf16.msra.mxu0 %v394_v2  ;;  %411 = vmatpush.bf16.msra.mxu1 %v394_v2 }
   0xb   :  { %412 = vmatpush.bf16.msra.mxu2 %v394_v2  ;;  %413 = vmatpush.bf16.msra.mxu3 %v394_v2 }
   0xe   :  { %186 = vmatpush.bf16.msra.mxu0 %v393_v3  ;;  %414 = vmatpush.bf16.msra.mxu1 %v393_v3 }
   0xf   :  { %415 = vmatpush.bf16.msra.mxu2 %v393_v3  ;;  %416 = vmatpush.bf16.msra.mxu3 %v393_v3 }
  0x12   :  { %187 = vmatpush.bf16.msra.mxu0 %v392_v4  ;;  %417 = vmatpush.bf16.msra.mxu1 %v392_v4 }
  0x13   :  { %418 = vmatpush.bf16.msra.mxu2 %v392_v4  ;;  %419 = vmatpush.bf16.msra.mxu3 %v392_v4 }
  0x16   :  { %188 = vmatpush.bf16.msra.mxu0 %v391_v5  ;;  %420 = vmatpush.bf16.msra.mxu1 %v391_v5 }
  0x17   :  { %421 = vmatpush.bf16.msra.mxu2 %v391_v5  ;;  %422 = vmatpush.bf16.msra.mxu3 %v391_v5 }
  0x1a   :  { %189 = vmatpush.bf16.msra.mxu0 %v390_v6  ;;  %423 = vmatpush.bf16.msra.mxu1 %v390_v6 }
  0x1b   :  { %424 = vmatpush.bf16.msra.mxu2 %v390_v6  ;;  %425 = vmatpush.bf16.msra.mxu3 %v390_v6 }
  0x1e   :  { %190 = vmatpush.bf16.msra.mxu0 %v389_v7  ;;  %426 = vmatpush.bf16.msra.mxu1 %v389_v7 }
  0x1f   :  { %427 = vmatpush.bf16.msra.mxu2 %v389_v7  ;;  %428 = vmatpush.bf16.msra.mxu3 %v389_v7 }
  0x21   :  { %191 = vmatmul.bf16.vlgmr.msra.gmra.mxu0 %v397_v8  ;;  %201 = vmatmul.bf16.vlgmr.msra.gmra.mxu1 %v399_v9 }
  0x22   :  { %211 = vmatmul.bf16.vlgmr.msra.gmra.mxu2 %v401_v10  ;;  %221 = vmatmul.bf16.vlgmr.msra.gmra.mxu3 %v403_v11 }
  0x31   :  { %196 = vmatmul.bf16.gmra.mxu0 %v398_v12  ;;  %206 = vmatmul.bf16.gmra.mxu1 %v400_v13 }
  0x32   :  { %216 = vmatmul.bf16.gmra.mxu2 %v402_v14  ;;  %226 = vmatmul.bf16.gmra.mxu3 %v404_v15 }
  0x9e   :  { %v192_v17 = vpop.f32.mrf.mxu0  ;;  %v202_v18 = vpop.f32.mrf.mxu1 }
  0x9f   :  { %v287_v19 = vadd.f32 %v429_v16, %v192_v17  ;;  %v291_v20 = vadd.f32 %v429_v16, %v202_v18 }
  0xa1   :  { %303 = vst [vmem:[%s552_s3] sm:$0xff] %v287_v19 }
  0xa2   :  { %307 = vst [vmem:[%s552_s3 + $0x20] sm:$0xff] %v291_v20 }
  0xa5   :  { %v212_v21 = vpop.f32.mrf.mxu2  ;;  %v222_v22 = vpop.f32.mrf.mxu3 }
  0xa6   :  { %v295_v23 = vadd.f32 %v429_v16, %v212_v21  ;;  %v299_v24 = vadd.f32 %v429_v16, %v222_v22  ;;  %v194_v25 = vpop.f32.mrf.mxu0  ;;  %v204_v26 = vpop.f32.mrf.mxu1 }
  0xa7   :  { %v288_v27 = vadd.f32 %v429_v16, %v194_v25  ;;  %v292_v28 = vadd.f32 %v429_v16, %v204_v26 }
  0xa8   :  { %311 = vst [vmem:[%s552_s3 + $0x40] sm:$0xff] %v295_v23 }
  0xa9   :  { %315 = vst [vmem:[%s552_s3 + $0x60] sm:$0xff] %v299_v24 }
  0xaa   :  { %304 = vst [vmem:[%s552_s3 + $0x8] sm:$0xff] %v288_v27 }
  0xab   :  { %308 = vst [vmem:[%s552_s3 + $0x28] sm:$0xff] %v292_v28 }
  0xad   :  { %v214_v29 = vpop.f32.mrf.mxu2  ;;  %v224_v30 = vpop.f32.mrf.mxu3 }
  0xae   :  { %v296_v31 = vadd.f32 %v429_v16, %v214_v29  ;;  %v300_v32 = vadd.f32 %v429_v16, %v224_v30  ;;  %v197_v33 = vpop.f32.mrf.mxu0  ;;  %v207_v34 = vpop.f32.mrf.mxu1 }
  0xaf   :  { %v289_v35 = vadd.f32 %v429_v16, %v197_v33  ;;  %v293_v36 = vadd.f32 %v429_v16, %v207_v34 }
  0xb0   :  { %312 = vst [vmem:[%s552_s3 + $0x48] sm:$0xff] %v296_v31 }
  0xb1   :  { %316 = vst [vmem:[%s552_s3 + $0x68] sm:$0xff] %v300_v32 }
  0xb2   :  { %305 = vst [vmem:[%s552_s3 + $0x10] sm:$0xff] %v289_v35 }
  0xb3   :  { %309 = vst [vmem:[%s552_s3 + $0x30] sm:$0xff] %v293_v36 }
  0xb5   :  { %v217_v37 = vpop.f32.mrf.mxu2  ;;  %v227_v38 = vpop.f32.mrf.mxu3 }
  0xb6   :  { %v297_v39 = vadd.f32 %v429_v16, %v217_v37  ;;  %v301_v40 = vadd.f32 %v429_v16, %v227_v38  ;;  %v199_v41 = vpop.f32.mrf.mxu0  ;;  %v209_v42 = vpop.f32.mrf.mxu1 }
  0xb7   :  { %v290_v43 = vadd.f32 %v429_v16, %v199_v41  ;;  %v294_v44 = vadd.f32 %v429_v16, %v209_v42 }
  0xb8   :  { %313 = vst [vmem:[%s552_s3 + $0x50] sm:$0xff] %v297_v39 }
  0xb9   :  { %317 = vst [vmem:[%s552_s3 + $0x70] sm:$0xff] %v301_v40 }
  0xba   :  { %306 = vst [vmem:[%s552_s3 + $0x18] sm:$0xff] %v290_v43 }
  0xbb   :  { %310 = vst [vmem:[%s552_s3 + $0x38] sm:$0xff] %v294_v44 }
  0xbd   :  { %v219_v45 = vpop.f32.mrf.mxu2  ;;  %v229_v46 = vpop.f32.mrf.mxu3 }
  0xbe   :  { %v298_v47 = vadd.f32 %v429_v16, %v219_v45  ;;  %v302_v48 = vadd.f32 %v429_v16, %v229_v46 }
  0xc0   :  { %314 = vst [vmem:[%s552_s3 + $0x58] sm:$0xff] %v298_v47 }
  0xc1   :  { %318 = vst [vmem:[%s552_s3 + $0x78] sm:$0xff] %v302_v48 }

</bundles_post_ra>
